<compile_context>
chip_gen: v7x
topology: tpu7x:2x2x1
jax: 0.10.0
libtpu: 0.0.40
codegen_flags: <defaults>
</compile_context>

<pallas_src>
import numpy as np
import jax
import jax.numpy as jnp
from jax import lax
from jax.experimental import pallas as pl
from jax.experimental.pallas import tpu as pltpu


def _choose_batch_tile(N, Cin_p, Cm, Cf, HW, vmem_budget_bytes=40 << 20):
    """Batch elements per grid step.

    Sized against v7x's 64 MiB physical VMEM (budget ~= double-buffered I/O
    blocks + live f32 intermediates: B_TILE*HW*4*(2*(Cin+Cf)+~12*Cm)) while
    keeping the grid length >= 2 so both v7x TensorCores get work with
    dimension_semantics=("parallel",).  Safe on single-TC v5e/v6e too.
    """
    per_elem = HW * 4 * (2 * (Cin_p + Cf) + 12 * Cm)
    bt = max(1, min(N, vmem_budget_bytes // max(per_elem, 1)))
    if N >= 2:
        bt = min(bt, N // 2)          # keep >= 2 grid steps (v7x megacore)
    bt = max(bt, 1)
    while N % bt != 0:                # grid must tile the batch exactly
        bt -= 1
    return bt


def p2_forward_pallas(x_nchw, params):
    N, Cin, H, W = x_nchw.shape
    HW = H * W
    Cm = params["w1"].shape[0]            # out_channels_conv1
    Cf = params["aff2"].shape[0]          # out_channels_final
    assert Cm == Cf, "final elementwise multiply requires matching channels"

    # Pad input channels to a sublane multiple (8) so the conv1 MXU matmul
    # operands are aligned; the extra w1 columns are zero.
    Cin_p = ((Cin + 7) // 8) * 8
    w1 = params["w1"]
    if Cin_p != Cin:
        w1 = jnp.pad(w1, ((0, 0), (0, Cin_p - Cin)))

    B_TILE = _choose_batch_tile(N, Cin_p, Cm, Cf, HW)
    L = B_TILE * HW
    grid = (N // B_TILE,)

    # NCHW -> channel-major (C, N*H*W): one-off wrapper transpose; per grid
    # step a lane-dense (C, B_TILE*HW) slab, rolls stay on the lane axis.
    x_cl = x_nchw.reshape(N, Cin, HW).transpose(1, 0, 2)
    if Cin_p != Cin:
        x_cl = jnp.pad(x_cl, ((0, Cin_p - Cin), (0, 0), (0, 0)))
    x_cl = x_cl.reshape(Cin_p, N * HW)

    def kernel(x_ref, w1_ref, aff1_ref, wmix_ref, aff2_ref, o_ref, stk_ref):
        f32 = jnp.float32
        x = x_ref[...]                                           # (Cin_p, L)

        # ---- hoisted per-lane coordinates + the 12 boundary masks ---------
        flat = lax.broadcasted_iota(jnp.int32, (Cm, L), 1)
        hw = flat % HW                  # per-batch-element flat spatial index
        w_id = hw % W
        mw, mh = {}, {}
        for d in (1, 2, 3):
            mw[d] = w_id < (W - d)
            mw[-d] = w_id >= d
            mh[d] = hw < (HW - d * W)
            mh[-d] = hw >= d * W

        def sw(v, d):
            """value at (h, w+d); zero where w+d falls outside [0, W)."""
            return jnp.where(mw[d], pltpu.roll(v, (-d) % L, axis=1), 0.0)

        def sh(v, d):
            """value at (h+d, w); zero where h+d falls outside [0, H)."""
            return jnp.where(mh[d], pltpu.roll(v, (-d * W) % L, axis=1), 0.0)

        # ---- conv1 (1x1) on the MXU; eval-BN scale folded into w1 ---------
        z = jnp.dot(w1_ref[...], x, preferred_element_type=f32)  # (Cm, L)
        aff1 = aff1_ref[...]                                     # (Cm, 2)
        z = z + aff1[:, 0:1]
        p = jnp.where(z >= 0.0, z, aff1[:, 1:2] * z)             # PReLU

        # ---- chained stride-1 avg pools as UNNORMALIZED separable sums ----
        # (1/9 and 1/(9*25*49) divisors are folded into wmix offline)
        r1 = p + sw(p, 1) + sw(p, -1)
        pool1 = r1 + sh(r1, 1) + sh(r1, -1)                      # 9 * avg3(p)

        p1m1 = sw(pool1, -1)                                     # reused below
        p1p1 = sw(pool1, 1)
        r2 = pool1 + p1m1 + p1p1 + sw(pool1, 2) + sw(pool1, -2)
        pool2 = r2 + sh(r2, 1) + sh(r2, -1) + sh(r2, 2) + sh(r2, -2)

        r3 = (pool2 + sw(pool2, 1) + sw(pool2, -1) + sw(pool2, 2)
              + sw(pool2, -2) + sw(pool2, 3) + sw(pool2, -3))
        pool3 = (r3 + sh(r3, 1) + sh(r3, -1) + sh(r3, 2) + sh(r3, -2)
                 + sh(r3, 3) + sh(r3, -3))          # 11025 * avg7(avg5(avg3))

        # ---- grouped 3x3 conv folded into ONE (3Cf,6Cm)x(6Cm,L) matmul ----
        # stage the dx-shifted blocks through VMEM scratch (bounds live
        # ranges instead of a materialized concat); dy taps become two
        # masked rolls of the mixed result.
        stk_ref[0 * Cm:1 * Cm, :] = p1m1
        stk_ref[1 * Cm:2 * Cm, :] = pool1
        stk_ref[2 * Cm:3 * Cm, :] = p1p1
        stk_ref[3 * Cm:4 * Cm, :] = sw(pool3, -1)
        stk_ref[4 * Cm:5 * Cm, :] = pool3
        stk_ref[5 * Cm:6 * Cm, :] = sw(pool3, 1)
        t = jnp.dot(wmix_ref[...], stk_ref[...],
                    preferred_element_type=f32)                  # (3*Cf, L)

        conv2 = sh(t[0:Cf], -1) + t[Cf:2 * Cf] + sh(t[2 * Cf:3 * Cf], 1)
        aff2 = aff2_ref[...]                                     # (Cf, 2)
        z2 = conv2 + aff2[:, 0:1]
        out2 = jnp.where(z2 >= 0.0, z2, aff2[:, 1:2] * z2)       # PReLU

        o_ref[...] = (out2 * p).astype(o_ref.dtype)

    def invariant(shape):
        n = len(shape)
        return pl.BlockSpec(shape, lambda b: (0,) * n)

    out = pl.pallas_call(
        kernel,
        out_shape=jax.ShapeDtypeStruct((Cf, N * HW), jnp.float32),
        grid=grid,
        in_specs=[
            pl.BlockSpec((Cin_p, L), lambda b: (0, b)),   # input slab
            invariant((Cm, Cin_p)),        # w1 (1x1 conv, s1-folded, padded)
            invariant((Cm, 2)),            # aff1: [bn bias, prelu a]
            invariant((3 * Cf, 6 * Cm)),   # fused grouped-conv channel mixer
            invariant((Cf, 2)),            # aff2: [bn bias, prelu a]
        ],
        out_specs=pl.BlockSpec((Cf, L), lambda b: (0, b)),
        scratch_shapes=[pltpu.VMEM((6 * Cm, L), jnp.float32)],
        compiler_params=pltpu.CompilerParams(
            dimension_semantics=("parallel",),
            vmem_limit_bytes=48 * 1024 * 1024),
    )(x_cl, w1, params["aff1"], params["wmix"], params["aff2"])

    return out.reshape(Cf, N, HW).transpose(1, 0, 2).reshape(N, Cf, H, W)


def build_params(key, Cin, Cm, Cf, eps=1e-5):
    Cc = 3 * Cm
    assert Cc % Cf == 0, "grouped conv constraint of the torch module"
    assert Cm == Cf, "final elementwise multiply requires matching channels"
    Cg = Cc // Cf

    ks = jax.random.split(key, 10)
    w_conv1 = 0.3 * jax.random.normal(ks[0], (Cm, Cin, 1, 1), jnp.float32)
    g1 = 0.5 + jax.random.uniform(ks[1], (Cm,), jnp.float32)
    b1 = 0.1 * jax.random.normal(ks[2], (Cm,), jnp.float32)
    rm1 = 0.1 * jax.random.normal(ks[3], (Cm,), jnp.float32)
    rv1 = 0.5 + jax.random.uniform(ks[4], (Cm,), jnp.float32)
    a1 = jnp.full((Cm,), 0.25, jnp.float32)            # PReLU default init

    w_conv2 = 0.2 * jax.random.normal(ks[5], (Cf, Cg, 3, 3), jnp.float32)
    g2 = 0.5 + jax.random.uniform(ks[6], (Cf,), jnp.float32)
    b2 = 0.1 * jax.random.normal(ks[7], (Cf,), jnp.float32)
    rm2 = 0.1 * jax.random.normal(ks[8], (Cf,), jnp.float32)
    rv2 = 0.5 + jax.random.uniform(ks[9], (Cf,), jnp.float32)
    a2 = jnp.full((Cf,), 0.25, jnp.float32)

    s1 = g1 / jnp.sqrt(rv1 + eps); o1 = b1 - rm1 * s1  # folded eval BatchNorm
    s2 = g2 / jnp.sqrt(rv2 + eps); o2 = b2 - rm2 * s2

    # conv1 weights with the BN scale folded in (kernel only adds the bias).
    w1 = np.asarray(w_conv1)[:, :, 0, 0] * np.asarray(s1)[:, None]

    # Block-sparse channel mixer of the grouped 3x3 conv, fused with the
    # [pool1, pool1, pool3] concat, the eval-BN scale s2, and the average
    # pool divisors (pool1: 1/9, pool3: 1/(9*25*49)).  Laid out for one
    # (3*Cf, 6*Cm) matmul: rows blocked by ky (dy tap), columns by
    # [pool1 dx=-1,0,+1 | pool3 dx=-1,0,+1].
    w2 = np.asarray(w_conv2)
    Mab = np.zeros((3, 3, Cf, Cm), np.float32)   # pool1 contribution [ky,kx,o,j]
    Mc = np.zeros((3, 3, Cf, Cm), np.float32)    # pool3 contribution
    for o in range(Cf):
        for c in range(Cg):
            cc = o * Cg + c                       # channel in concatenated input
            if cc < Cm:
                Mab[:, :, o, cc] += w2[o, c]
            elif cc < 2 * Cm:
                Mab[:, :, o, cc - Cm] += w2[o, c]   # pool1 appears twice in cat
            else:
                Mc[:, :, o, cc - 2 * Cm] += w2[o, c]

    s2_col = np.asarray(s2, np.float32)[:, None]
    inv9 = np.float32(1.0 / 9.0)
    inv11025 = np.float32(1.0 / (9.0 * 25.0 * 49.0))
    wmix = np.zeros((3 * Cf, 6 * Cm), np.float32)
    for ky in range(3):
        for kx in range(3):
            wmix[ky * Cf:(ky + 1) * Cf, kx * Cm:(kx + 1) * Cm] = \
                Mab[ky, kx] * s2_col * inv9
            wmix[ky * Cf:(ky + 1) * Cf, (3 + kx) * Cm:(4 + kx) * Cm] = \
                Mc[ky, kx] * s2_col * inv11025

    params = dict(
        w1=jnp.asarray(w1),                                   # (Cm, Cin) s1-folded
        aff1=jnp.stack([o1, a1], axis=1),                     # (Cm, 2)
        aff2=jnp.stack([o2, a2], axis=1),                     # (Cf, 2)
        wmix=jnp.asarray(wmix),                               # (3*Cf, 6*Cm)
    )
    raw = dict(w_conv1=w_conv1, w_conv2=w_conv2,
               s1=s1, o1=o1, a1=a1, s2=s2, o2=o2, a2=a2)
    return params, raw


def p2_forward_reference(x, raw, Cf):
    """Plain-JAX mirror of P2Module.forward (eval-mode BN) for validation."""
    hi = lax.Precision.HIGHEST
    y = lax.conv_general_dilated(x, raw["w_conv1"], (1, 1), 'VALID',
                                 dimension_numbers=('NCHW', 'OIHW', 'NCHW'),
                                 precision=hi)
    y = y * raw["s1"][None, :, None, None] + raw["o1"][None, :, None, None]
    y = jnp.where(y >= 0, y, raw["a1"][None, :, None, None] * y)

    def avg_pool(t, k):
        p = k // 2
        s = lax.reduce_window(t, 0.0, lax.add, (1, 1, k, k), (1, 1, 1, 1),
                              ((0, 0), (0, 0), (p, p), (p, p)))
        return s / float(k * k)

    p1 = avg_pool(y, 3)
    p2 = avg_pool(p1, 5)
    p3 = avg_pool(p2, 7)
    cat = jnp.concatenate([p1, p1, p3], axis=1)
    y2 = lax.conv_general_dilated(cat, raw["w_conv2"], (1, 1),
                                  ((1, 1), (1, 1)),
                                  dimension_numbers=('NCHW', 'OIHW', 'NCHW'),
                                  feature_group_count=Cf,
                                  precision=hi)
    y2 = y2 * raw["s2"][None, :, None, None] + raw["o2"][None, :, None, None]
    y2 = jnp.where(y2 >= 0, y2, raw["a2"][None, :, None, None] * y2)
    return y2 * y


if __name__ == "__main__":
    N, Cin, H, W = 2, 4, 16, 16
    Cm, Cf = 8, 8                     # out_channels_conv1, out_channels_final

    key = jax.random.PRNGKey(0)
    kx, kp = jax.random.split(key)
    x = jax.random.normal(kx, (N, Cin, H, W), jnp.float32)
    params, raw = build_params(kp, Cin, Cm, Cf)

    out = jax.block_until_ready(p2_forward_pallas(x, params))
    assert out.shape == (N, Cf, H, W)

    ref = p2_forward_reference(x, raw, Cf)
    tol = 1e-2   # pipeline is f32 end to end (pool divisors folded offline)
    ok = bool(jnp.all(jnp.abs(out - ref) <= tol + tol * jnp.abs(ref)))
    assert ok, "Pallas output does not match reference"

    print("KERNEL_OK")
</pallas_src>

<mosaic_0001>
module attributes {stable_mosaic.version = 11 : i64} {
  func.func @kernel(%arg0: i32, %arg1: memref<8x256xf32, #tpu.memory_space<vmem>>, %arg2: memref<8x8xf32, #tpu.memory_space<vmem>>, %arg3: memref<8x2xf32, #tpu.memory_space<vmem>>, %arg4: memref<24x48xf32, #tpu.memory_space<vmem>>, %arg5: memref<8x2xf32, #tpu.memory_space<vmem>>, %arg6: memref<8x256xf32, #tpu.memory_space<vmem>>, %arg7: memref<48x256xf32, #tpu.memory_space<vmem>>) attributes {dimension_semantics = [#tpu.dimension_semantics<parallel>], iteration_bounds = array<i64: 2>, scalar_prefetch = 0 : i64, scratch_operands = 1 : i64, tpu.core_type = #tpu.core_type<tc>, window_params = [{transform_indices = @transform_0, window_bounds = array<i64: 8, 256>}, {pipeline_mode = #tpu.pipeline_mode<synchronous>, transform_indices = @transform_1, window_bounds = array<i64: 8, 8>}, {pipeline_mode = #tpu.pipeline_mode<synchronous>, transform_indices = @transform_2, window_bounds = array<i64: 8, 2>}, {pipeline_mode = #tpu.pipeline_mode<synchronous>, transform_indices = @transform_3, window_bounds = array<i64: 24, 48>}, {pipeline_mode = #tpu.pipeline_mode<synchronous>, transform_indices = @transform_4, window_bounds = array<i64: 8, 2>}, {transform_indices = @transform_5, window_bounds = array<i64: 8, 256>}]} {
    %c0 = arith.constant 0 : index
    %c0_0 = arith.constant 0 : index
    %0 = vector.load %arg1[%c0, %c0_0] : memref<8x256xf32, #tpu.memory_space<vmem>>, vector<8x256xf32>
    %1 = tpu.iota {dimensions = array<i32: 1>} : vector<8x256xi32>
    %c256_i32 = arith.constant 256 : i32
    %c0_i32 = arith.constant 0 : i32
    %2 = arith.cmpi eq, %c256_i32, %c0_i32 : i32
    %c1_i32 = arith.constant 1 : i32
    %3 = arith.select %2, %c1_i32, %c256_i32 : i32
    %4 = vector.broadcast %3 : i32 to vector<8x256xi32>
    %5 = arith.remsi %1, %4 : vector<8x256xi32>
    %c0_i32_1 = arith.constant 0 : i32
    %6 = vector.broadcast %c0_i32_1 : i32 to vector<8x256xi32>
    %7 = arith.cmpi ne, %5, %6 : vector<8x256xi32>
    %c0_i32_2 = arith.constant 0 : i32
    %8 = vector.broadcast %c0_i32_2 : i32 to vector<8x256xi32>
    %9 = arith.cmpi slt, %5, %8 : vector<8x256xi32>
    %c0_i32_3 = arith.constant 0 : i32
    %10 = arith.cmpi slt, %3, %c0_i32_3 : i32
    %11 = vector.broadcast %10 : i1 to vector<8x256xi1>
    %12 = vector.broadcast %11 : vector<8x256xi1> to vector<8x256xi1>
    %13 = arith.xori %9, %12 : vector<8x256xi1>
    %14 = arith.andi %13, %7 : vector<8x256xi1>
    %15 = vector.broadcast %3 : i32 to vector<8x256xi32>
    %16 = arith.addi %5, %15 : vector<8x256xi32>
    %17 = arith.select %14, %16, %5 : vector<8x256xi1>, vector<8x256xi32>
    %c16_i32 = arith.constant 16 : i32
    %c0_i32_4 = arith.constant 0 : i32
    %18 = arith.cmpi eq, %c16_i32, %c0_i32_4 : i32
    %c1_i32_5 = arith.constant 1 : i32
    %19 = arith.select %18, %c1_i32_5, %c16_i32 : i32
    %20 = vector.broadcast %19 : i32 to vector<8x256xi32>
    %21 = arith.remsi %17, %20 : vector<8x256xi32>
    %c0_i32_6 = arith.constant 0 : i32
    %22 = vector.broadcast %c0_i32_6 : i32 to vector<8x256xi32>
    %23 = arith.cmpi ne, %21, %22 : vector<8x256xi32>
    %c0_i32_7 = arith.constant 0 : i32
    %24 = vector.broadcast %c0_i32_7 : i32 to vector<8x256xi32>
    %25 = arith.cmpi slt, %21, %24 : vector<8x256xi32>
    %c0_i32_8 = arith.constant 0 : i32
    %26 = arith.cmpi slt, %19, %c0_i32_8 : i32
    %27 = vector.broadcast %26 : i1 to vector<8x256xi1>
    %28 = vector.broadcast %27 : vector<8x256xi1> to vector<8x256xi1>
    %29 = arith.xori %25, %28 : vector<8x256xi1>
    %30 = arith.andi %29, %23 : vector<8x256xi1>
    %31 = vector.broadcast %19 : i32 to vector<8x256xi32>
    %32 = arith.addi %21, %31 : vector<8x256xi32>
    %33 = arith.select %30, %32, %21 : vector<8x256xi1>, vector<8x256xi32>
    %c15_i32 = arith.constant 15 : i32
    %34 = vector.broadcast %c15_i32 : i32 to vector<8x256xi32>
    %35 = arith.cmpi slt, %33, %34 : vector<8x256xi32>
    %c1_i32_9 = arith.constant 1 : i32
    %36 = vector.broadcast %c1_i32_9 : i32 to vector<8x256xi32>
    %37 = arith.cmpi sge, %33, %36 : vector<8x256xi32>
    %c240_i32 = arith.constant 240 : i32
    %38 = vector.broadcast %c240_i32 : i32 to vector<8x256xi32>
    %39 = arith.cmpi slt, %17, %38 : vector<8x256xi32>
    %c16_i32_10 = arith.constant 16 : i32
    %40 = vector.broadcast %c16_i32_10 : i32 to vector<8x256xi32>
    %41 = arith.cmpi sge, %17, %40 : vector<8x256xi32>
    %c14_i32 = arith.constant 14 : i32
    %42 = vector.broadcast %c14_i32 : i32 to vector<8x256xi32>
    %43 = arith.cmpi slt, %33, %42 : vector<8x256xi32>
    %c2_i32 = arith.constant 2 : i32
    %44 = vector.broadcast %c2_i32 : i32 to vector<8x256xi32>
    %45 = arith.cmpi sge, %33, %44 : vector<8x256xi32>
    %c224_i32 = arith.constant 224 : i32
    %46 = vector.broadcast %c224_i32 : i32 to vector<8x256xi32>
    %47 = arith.cmpi slt, %17, %46 : vector<8x256xi32>
    %c32_i32 = arith.constant 32 : i32
    %48 = vector.broadcast %c32_i32 : i32 to vector<8x256xi32>
    %49 = arith.cmpi sge, %17, %48 : vector<8x256xi32>
    %c13_i32 = arith.constant 13 : i32
    %50 = vector.broadcast %c13_i32 : i32 to vector<8x256xi32>
    %51 = arith.cmpi slt, %33, %50 : vector<8x256xi32>
    %c3_i32 = arith.constant 3 : i32
    %52 = vector.broadcast %c3_i32 : i32 to vector<8x256xi32>
    %53 = arith.cmpi sge, %33, %52 : vector<8x256xi32>
    %c208_i32 = arith.constant 208 : i32
    %54 = vector.broadcast %c208_i32 : i32 to vector<8x256xi32>
    %55 = arith.cmpi slt, %17, %54 : vector<8x256xi32>
    %c48_i32 = arith.constant 48 : i32
    %56 = vector.broadcast %c48_i32 : i32 to vector<8x256xi32>
    %57 = arith.cmpi sge, %17, %56 : vector<8x256xi32>
    %c0_11 = arith.constant 0 : index
    %c0_12 = arith.constant 0 : index
    %58 = vector.load %arg2[%c0_11, %c0_12] : memref<8x8xf32, #tpu.memory_space<vmem>>, vector<8x8xf32>
    %cst = arith.constant dense<0.000000e+00> : vector<8x256xf32>
    %59 = tpu.matmul %58, %0, %cst {dimension_numbers = #tpu.dot_dimension_numbers<[1], [0], [0], [1], [0, 0, 1, 1], [], []>} : vector<8x8xf32>, vector<8x256xf32>, vector<8x256xf32> -> vector<8x256xf32>
    %c0_13 = arith.constant 0 : index
    %c0_14 = arith.constant 0 : index
    %60 = vector.load %arg3[%c0_13, %c0_14] : memref<8x2xf32, #tpu.memory_space<vmem>>, vector<8x2xf32>
    %61 = vector.extract_strided_slice %60 {offsets = [0, 0], sizes = [8, 1], strides = [1, 1]} : vector<8x2xf32> to vector<8x1xf32>
    %62 = vector.broadcast %61 : vector<8x1xf32> to vector<8x256xf32>
    %63 = arith.addf %59, %62 : vector<8x256xf32>
    %cst_15 = arith.constant 0.000000e+00 : f32
    %64 = vector.broadcast %cst_15 : f32 to vector<8x256xf32>
    %65 = arith.cmpf oge, %63, %64 : vector<8x256xf32>
    %66 = vector.extract_strided_slice %60 {offsets = [0, 1], sizes = [8, 1], strides = [1, 1]} : vector<8x2xf32> to vector<8x1xf32>
    %67 = vector.broadcast %66 : vector<8x1xf32> to vector<8x256xf32>
    %68 = arith.mulf %67, %63 : vector<8x256xf32>
    %69 = arith.select %65, %63, %68 : vector<8x256xi1>, vector<8x256xf32>
    %c255_i32 = arith.constant 255 : i32
    %70 = tpu.dynamic_rotate %69 by %c255_i32 dim 1 : vector<8x256xf32>, i32 -> vector<8x256xf32>
    %cst_16 = arith.constant 0.000000e+00 : f32
    %71 = vector.broadcast %cst_16 : f32 to vector<8x256xf32>
    %72 = arith.select %35, %70, %71 : vector<8x256xi1>, vector<8x256xf32>
    %73 = arith.addf %69, %72 : vector<8x256xf32>
    %c1_i32_17 = arith.constant 1 : i32
    %74 = tpu.dynamic_rotate %69 by %c1_i32_17 dim 1 : vector<8x256xf32>, i32 -> vector<8x256xf32>
    %cst_18 = arith.constant 0.000000e+00 : f32
    %75 = vector.broadcast %cst_18 : f32 to vector<8x256xf32>
    %76 = arith.select %37, %74, %75 : vector<8x256xi1>, vector<8x256xf32>
    %77 = arith.addf %73, %76 : vector<8x256xf32>
    %c240_i32_19 = arith.constant 240 : i32
    %78 = tpu.dynamic_rotate %77 by %c240_i32_19 dim 1 : vector<8x256xf32>, i32 -> vector<8x256xf32>
    %cst_20 = arith.constant 0.000000e+00 : f32
    %79 = vector.broadcast %cst_20 : f32 to vector<8x256xf32>
    %80 = arith.select %39, %78, %79 : vector<8x256xi1>, vector<8x256xf32>
    %81 = arith.addf %77, %80 : vector<8x256xf32>
    %c16_i32_21 = arith.constant 16 : i32
    %82 = tpu.dynamic_rotate %77 by %c16_i32_21 dim 1 : vector<8x256xf32>, i32 -> vector<8x256xf32>
    %cst_22 = arith.constant 0.000000e+00 : f32
    %83 = vector.broadcast %cst_22 : f32 to vector<8x256xf32>
    %84 = arith.select %41, %82, %83 : vector<8x256xi1>, vector<8x256xf32>
    %85 = arith.addf %81, %84 : vector<8x256xf32>
    %c1_i32_23 = arith.constant 1 : i32
    %86 = tpu.dynamic_rotate %85 by %c1_i32_23 dim 1 : vector<8x256xf32>, i32 -> vector<8x256xf32>
    %cst_24 = arith.constant 0.000000e+00 : f32
    %87 = vector.broadcast %cst_24 : f32 to vector<8x256xf32>
    %88 = arith.select %37, %86, %87 : vector<8x256xi1>, vector<8x256xf32>
    %c255_i32_25 = arith.constant 255 : i32
    %89 = tpu.dynamic_rotate %85 by %c255_i32_25 dim 1 : vector<8x256xf32>, i32 -> vector<8x256xf32>
    %cst_26 = arith.constant 0.000000e+00 : f32
    %90 = vector.broadcast %cst_26 : f32 to vector<8x256xf32>
    %91 = arith.select %35, %89, %90 : vector<8x256xi1>, vector<8x256xf32>
    %92 = arith.addf %85, %88 : vector<8x256xf32>
    %93 = arith.addf %92, %91 : vector<8x256xf32>
    %c254_i32 = arith.constant 254 : i32
    %94 = tpu.dynamic_rotate %85 by %c254_i32 dim 1 : vector<8x256xf32>, i32 -> vector<8x256xf32>
    %cst_27 = arith.constant 0.000000e+00 : f32
    %95 = vector.broadcast %cst_27 : f32 to vector<8x256xf32>
    %96 = arith.select %43, %94, %95 : vector<8x256xi1>, vector<8x256xf32>
    %97 = arith.addf %93, %96 : vector<8x256xf32>
    %c2_i32_28 = arith.constant 2 : i32
    %98 = tpu.dynamic_rotate %85 by %c2_i32_28 dim 1 : vector<8x256xf32>, i32 -> vector<8x256xf32>
    %cst_29 = arith.constant 0.000000e+00 : f32
    %99 = vector.broadcast %cst_29 : f32 to vector<8x256xf32>
    %100 = arith.select %45, %98, %99 : vector<8x256xi1>, vector<8x256xf32>
    %101 = arith.addf %97, %100 : vector<8x256xf32>
    %c240_i32_30 = arith.constant 240 : i32
    %102 = tpu.dynamic_rotate %101 by %c240_i32_30 dim 1 : vector<8x256xf32>, i32 -> vector<8x256xf32>
    %cst_31 = arith.constant 0.000000e+00 : f32
    %103 = vector.broadcast %cst_31 : f32 to vector<8x256xf32>
    %104 = arith.select %39, %102, %103 : vector<8x256xi1>, vector<8x256xf32>
    %105 = arith.addf %101, %104 : vector<8x256xf32>
    %c16_i32_32 = arith.constant 16 : i32
    %106 = tpu.dynamic_rotate %101 by %c16_i32_32 dim 1 : vector<8x256xf32>, i32 -> vector<8x256xf32>
    %cst_33 = arith.constant 0.000000e+00 : f32
    %107 = vector.broadcast %cst_33 : f32 to vector<8x256xf32>
    %108 = arith.select %41, %106, %107 : vector<8x256xi1>, vector<8x256xf32>
    %109 = arith.addf %105, %108 : vector<8x256xf32>
    %c224_i32_34 = arith.constant 224 : i32
    %110 = tpu.dynamic_rotate %101 by %c224_i32_34 dim 1 : vector<8x256xf32>, i32 -> vector<8x256xf32>
    %cst_35 = arith.constant 0.000000e+00 : f32
    %111 = vector.broadcast %cst_35 : f32 to vector<8x256xf32>
    %112 = arith.select %47, %110, %111 : vector<8x256xi1>, vector<8x256xf32>
    %113 = arith.addf %109, %112 : vector<8x256xf32>
    %c32_i32_36 = arith.constant 32 : i32
    %114 = tpu.dynamic_rotate %101 by %c32_i32_36 dim 1 : vector<8x256xf32>, i32 -> vector<8x256xf32>
    %cst_37 = arith.constant 0.000000e+00 : f32
    %115 = vector.broadcast %cst_37 : f32 to vector<8x256xf32>
    %116 = arith.select %49, %114, %115 : vector<8x256xi1>, vector<8x256xf32>
    %117 = arith.addf %113, %116 : vector<8x256xf32>
    %c255_i32_38 = arith.constant 255 : i32
    %118 = tpu.dynamic_rotate %117 by %c255_i32_38 dim 1 : vector<8x256xf32>, i32 -> vector<8x256xf32>
    %cst_39 = arith.constant 0.000000e+00 : f32
    %119 = vector.broadcast %cst_39 : f32 to vector<8x256xf32>
    %120 = arith.select %35, %118, %119 : vector<8x256xi1>, vector<8x256xf32>
    %121 = arith.addf %117, %120 : vector<8x256xf32>
    %c1_i32_40 = arith.constant 1 : i32
    %122 = tpu.dynamic_rotate %117 by %c1_i32_40 dim 1 : vector<8x256xf32>, i32 -> vector<8x256xf32>
    %cst_41 = arith.constant 0.000000e+00 : f32
    %123 = vector.broadcast %cst_41 : f32 to vector<8x256xf32>
    %124 = arith.select %37, %122, %123 : vector<8x256xi1>, vector<8x256xf32>
    %125 = arith.addf %121, %124 : vector<8x256xf32>
    %c254_i32_42 = arith.constant 254 : i32
    %126 = tpu.dynamic_rotate %117 by %c254_i32_42 dim 1 : vector<8x256xf32>, i32 -> vector<8x256xf32>
    %cst_43 = arith.constant 0.000000e+00 : f32
    %127 = vector.broadcast %cst_43 : f32 to vector<8x256xf32>
    %128 = arith.select %43, %126, %127 : vector<8x256xi1>, vector<8x256xf32>
    %129 = arith.addf %125, %128 : vector<8x256xf32>
    %c2_i32_44 = arith.constant 2 : i32
    %130 = tpu.dynamic_rotate %117 by %c2_i32_44 dim 1 : vector<8x256xf32>, i32 -> vector<8x256xf32>
    %cst_45 = arith.constant 0.000000e+00 : f32
    %131 = vector.broadcast %cst_45 : f32 to vector<8x256xf32>
    %132 = arith.select %45, %130, %131 : vector<8x256xi1>, vector<8x256xf32>
    %133 = arith.addf %129, %132 : vector<8x256xf32>
    %c253_i32 = arith.constant 253 : i32
    %134 = tpu.dynamic_rotate %117 by %c253_i32 dim 1 : vector<8x256xf32>, i32 -> vector<8x256xf32>
    %cst_46 = arith.constant 0.000000e+00 : f32
    %135 = vector.broadcast %cst_46 : f32 to vector<8x256xf32>
    %136 = arith.select %51, %134, %135 : vector<8x256xi1>, vector<8x256xf32>
    %137 = arith.addf %133, %136 : vector<8x256xf32>
    %c3_i32_47 = arith.constant 3 : i32
    %138 = tpu.dynamic_rotate %117 by %c3_i32_47 dim 1 : vector<8x256xf32>, i32 -> vector<8x256xf32>
    %cst_48 = arith.constant 0.000000e+00 : f32
    %139 = vector.broadcast %cst_48 : f32 to vector<8x256xf32>
    %140 = arith.select %53, %138, %139 : vector<8x256xi1>, vector<8x256xf32>
    %141 = arith.addf %137, %140 : vector<8x256xf32>
    %c240_i32_49 = arith.constant 240 : i32
    %142 = tpu.dynamic_rotate %141 by %c240_i32_49 dim 1 : vector<8x256xf32>, i32 -> vector<8x256xf32>
    %cst_50 = arith.constant 0.000000e+00 : f32
    %143 = vector.broadcast %cst_50 : f32 to vector<8x256xf32>
    %144 = arith.select %39, %142, %143 : vector<8x256xi1>, vector<8x256xf32>
    %145 = arith.addf %141, %144 : vector<8x256xf32>
    %c16_i32_51 = arith.constant 16 : i32
    %146 = tpu.dynamic_rotate %141 by %c16_i32_51 dim 1 : vector<8x256xf32>, i32 -> vector<8x256xf32>
    %cst_52 = arith.constant 0.000000e+00 : f32
    %147 = vector.broadcast %cst_52 : f32 to vector<8x256xf32>
    %148 = arith.select %41, %146, %147 : vector<8x256xi1>, vector<8x256xf32>
    %149 = arith.addf %145, %148 : vector<8x256xf32>
    %c224_i32_53 = arith.constant 224 : i32
    %150 = tpu.dynamic_rotate %141 by %c224_i32_53 dim 1 : vector<8x256xf32>, i32 -> vector<8x256xf32>
    %cst_54 = arith.constant 0.000000e+00 : f32
    %151 = vector.broadcast %cst_54 : f32 to vector<8x256xf32>
    %152 = arith.select %47, %150, %151 : vector<8x256xi1>, vector<8x256xf32>
    %153 = arith.addf %149, %152 : vector<8x256xf32>
    %c32_i32_55 = arith.constant 32 : i32
    %154 = tpu.dynamic_rotate %141 by %c32_i32_55 dim 1 : vector<8x256xf32>, i32 -> vector<8x256xf32>
    %cst_56 = arith.constant 0.000000e+00 : f32
    %155 = vector.broadcast %cst_56 : f32 to vector<8x256xf32>
    %156 = arith.select %49, %154, %155 : vector<8x256xi1>, vector<8x256xf32>
    %157 = arith.addf %153, %156 : vector<8x256xf32>
    %c208_i32_57 = arith.constant 208 : i32
    %158 = tpu.dynamic_rotate %141 by %c208_i32_57 dim 1 : vector<8x256xf32>, i32 -> vector<8x256xf32>
    %cst_58 = arith.constant 0.000000e+00 : f32
    %159 = vector.broadcast %cst_58 : f32 to vector<8x256xf32>
    %160 = arith.select %55, %158, %159 : vector<8x256xi1>, vector<8x256xf32>
    %161 = arith.addf %157, %160 : vector<8x256xf32>
    %c48_i32_59 = arith.constant 48 : i32
    %162 = tpu.dynamic_rotate %141 by %c48_i32_59 dim 1 : vector<8x256xf32>, i32 -> vector<8x256xf32>
    %cst_60 = arith.constant 0.000000e+00 : f32
    %163 = vector.broadcast %cst_60 : f32 to vector<8x256xf32>
    %164 = arith.select %57, %162, %163 : vector<8x256xi1>, vector<8x256xf32>
    %165 = arith.addf %161, %164 : vector<8x256xf32>
    %c0_61 = arith.constant 0 : index
    %c0_62 = arith.constant 0 : index
    %166 = vector.load %arg7[%c0_61, %c0_62] : memref<48x256xf32, #tpu.memory_space<vmem>>, vector<8x256xf32>
    tpu.vector_store %arg7[%c0_61, %c0_62], %88 {strides = array<i32>} : memref<48x256xf32, #tpu.memory_space<vmem>>, vector<8x256xf32>,
    %c8 = arith.constant 8 : index
    %c0_63 = arith.constant 0 : index
    %167 = vector.load %arg7[%c8, %c0_63] : memref<48x256xf32, #tpu.memory_space<vmem>>, vector<8x256xf32>
    tpu.vector_store %arg7[%c8, %c0_63], %85 {strides = array<i32>} : memref<48x256xf32, #tpu.memory_space<vmem>>, vector<8x256xf32>,
    %c16 = arith.constant 16 : index
    %c0_64 = arith.constant 0 : index
    %168 = vector.load %arg7[%c16, %c0_64] : memref<48x256xf32, #tpu.memory_space<vmem>>, vector<8x256xf32>
    tpu.vector_store %arg7[%c16, %c0_64], %91 {strides = array<i32>} : memref<48x256xf32, #tpu.memory_space<vmem>>, vector<8x256xf32>,
    %c1_i32_65 = arith.constant 1 : i32
    %169 = tpu.dynamic_rotate %165 by %c1_i32_65 dim 1 : vector<8x256xf32>, i32 -> vector<8x256xf32>
    %cst_66 = arith.constant 0.000000e+00 : f32
    %170 = vector.broadcast %cst_66 : f32 to vector<8x256xf32>
    %171 = arith.select %37, %169, %170 : vector<8x256xi1>, vector<8x256xf32>
    %c24 = arith.constant 24 : index
    %c0_67 = arith.constant 0 : index
    %172 = vector.load %arg7[%c24, %c0_67] : memref<48x256xf32, #tpu.memory_space<vmem>>, vector<8x256xf32>
    tpu.vector_store %arg7[%c24, %c0_67], %171 {strides = array<i32>} : memref<48x256xf32, #tpu.memory_space<vmem>>, vector<8x256xf32>,
    %c32 = arith.constant 32 : index
    %c0_68 = arith.constant 0 : index
    %173 = vector.load %arg7[%c32, %c0_68] : memref<48x256xf32, #tpu.memory_space<vmem>>, vector<8x256xf32>
    tpu.vector_store %arg7[%c32, %c0_68], %165 {strides = array<i32>} : memref<48x256xf32, #tpu.memory_space<vmem>>, vector<8x256xf32>,
    %c255_i32_69 = arith.constant 255 : i32
    %174 = tpu.dynamic_rotate %165 by %c255_i32_69 dim 1 : vector<8x256xf32>, i32 -> vector<8x256xf32>
    %cst_70 = arith.constant 0.000000e+00 : f32
    %175 = vector.broadcast %cst_70 : f32 to vector<8x256xf32>
    %176 = arith.select %35, %174, %175 : vector<8x256xi1>, vector<8x256xf32>
    %c40 = arith.constant 40 : index
    %c0_71 = arith.constant 0 : index
    %177 = vector.load %arg7[%c40, %c0_71] : memref<48x256xf32, #tpu.memory_space<vmem>>, vector<8x256xf32>
    tpu.vector_store %arg7[%c40, %c0_71], %176 {strides = array<i32>} : memref<48x256xf32, #tpu.memory_space<vmem>>, vector<8x256xf32>,
    %c0_72 = arith.constant 0 : index
    %c0_73 = arith.constant 0 : index
    %178 = vector.load %arg4[%c0_72, %c0_73] : memref<24x48xf32, #tpu.memory_space<vmem>>, vector<24x48xf32>
    %c0_74 = arith.constant 0 : index
    %c0_75 = arith.constant 0 : index
    %179 = vector.load %arg7[%c0_74, %c0_75] : memref<48x256xf32, #tpu.memory_space<vmem>>, vector<48x256xf32>
    %cst_76 = arith.constant dense<0.000000e+00> : vector<24x256xf32>
    %180 = tpu.matmul %178, %179, %cst_76 {dimension_numbers = #tpu.dot_dimension_numbers<[1], [0], [0], [1], [0, 0, 1, 1], [], []>} : vector<24x48xf32>, vector<48x256xf32>, vector<24x256xf32> -> vector<24x256xf32>
    %181 = vector.extract_strided_slice %180 {offsets = [0, 0], sizes = [8, 256], strides = [1, 1]} : vector<24x256xf32> to vector<8x256xf32>
    %c16_i32_77 = arith.constant 16 : i32
    %182 = tpu.dynamic_rotate %181 by %c16_i32_77 dim 1 : vector<8x256xf32>, i32 -> vector<8x256xf32>
    %cst_78 = arith.constant 0.000000e+00 : f32
    %183 = vector.broadcast %cst_78 : f32 to vector<8x256xf32>
    %184 = arith.select %41, %182, %183 : vector<8x256xi1>, vector<8x256xf32>
    %185 = vector.extract_strided_slice %180 {offsets = [8, 0], sizes = [8, 256], strides = [1, 1]} : vector<24x256xf32> to vector<8x256xf32>
    %186 = arith.addf %184, %185 : vector<8x256xf32>
    %187 = vector.extract_strided_slice %180 {offsets = [16, 0], sizes = [8, 256], strides = [1, 1]} : vector<24x256xf32> to vector<8x256xf32>
    %c240_i32_79 = arith.constant 240 : i32
    %188 = tpu.dynamic_rotate %187 by %c240_i32_79 dim 1 : vector<8x256xf32>, i32 -> vector<8x256xf32>
    %cst_80 = arith.constant 0.000000e+00 : f32
    %189 = vector.broadcast %cst_80 : f32 to vector<8x256xf32>
    %190 = arith.select %39, %188, %189 : vector<8x256xi1>, vector<8x256xf32>
    %191 = arith.addf %186, %190 : vector<8x256xf32>
    %c0_81 = arith.constant 0 : index
    %c0_82 = arith.constant 0 : index
    %192 = vector.load %arg5[%c0_81, %c0_82] : memref<8x2xf32, #tpu.memory_space<vmem>>, vector<8x2xf32>
    %193 = vector.extract_strided_slice %192 {offsets = [0, 0], sizes = [8, 1], strides = [1, 1]} : vector<8x2xf32> to vector<8x1xf32>
    %194 = vector.broadcast %193 : vector<8x1xf32> to vector<8x256xf32>
    %195 = arith.addf %191, %194 : vector<8x256xf32>
    %cst_83 = arith.constant 0.000000e+00 : f32
    %196 = vector.broadcast %cst_83 : f32 to vector<8x256xf32>
    %197 = arith.cmpf oge, %195, %196 : vector<8x256xf32>
    %198 = vector.extract_strided_slice %192 {offsets = [0, 1], sizes = [8, 1], strides = [1, 1]} : vector<8x2xf32> to vector<8x1xf32>
    %199 = vector.broadcast %198 : vector<8x1xf32> to vector<8x256xf32>
    %200 = arith.mulf %199, %195 : vector<8x256xf32>
    %201 = arith.select %197, %195, %200 : vector<8x256xi1>, vector<8x256xf32>
    %202 = arith.mulf %201, %69 : vector<8x256xf32>
    %c0_84 = arith.constant 0 : index
    %c0_85 = arith.constant 0 : index
    %203 = vector.load %arg6[%c0_84, %c0_85] : memref<8x256xf32, #tpu.memory_space<vmem>>, vector<8x256xf32>
    tpu.vector_store %arg6[%c0_84, %c0_85], %202 {strides = array<i32>} : memref<8x256xf32, #tpu.memory_space<vmem>>, vector<8x256xf32>,
    return
  }
  func.func @transform_0(%arg0: i32) -> (i32, i32) {
    %c0_i32 = arith.constant 0 : i32
    %c0_i32_0 = arith.constant 0 : i32
    return %c0_i32, %arg0 : i32, i32
  }
  func.func @transform_1(%arg0: i32) -> (i32, i32) {
    %c0_i32 = arith.constant 0 : i32
    %c0_i32_0 = arith.constant 0 : i32
    %c0_i32_1 = arith.constant 0 : i32
    return %c0_i32, %c0_i32_0 : i32, i32
  }
  func.func @transform_2(%arg0: i32) -> (i32, i32) {
    %c0_i32 = arith.constant 0 : i32
    %c0_i32_0 = arith.constant 0 : i32
    %c0_i32_1 = arith.constant 0 : i32
    return %c0_i32, %c0_i32_0 : i32, i32
  }
  func.func @transform_3(%arg0: i32) -> (i32, i32) {
    %c0_i32 = arith.constant 0 : i32
    %c0_i32_0 = arith.constant 0 : i32
    %c0_i32_1 = arith.constant 0 : i32
    return %c0_i32, %c0_i32_0 : i32, i32
  }
  func.func @transform_4(%arg0: i32) -> (i32, i32) {
    %c0_i32 = arith.constant 0 : i32
    %c0_i32_0 = arith.constant 0 : i32
    %c0_i32_1 = arith.constant 0 : i32
    return %c0_i32, %c0_i32_0 : i32, i32
  }
  func.func @transform_5(%arg0: i32) -> (i32, i32) {
    %c0_i32 = arith.constant 0 : i32
    %c0_i32_0 = arith.constant 0 : i32
    return %c0_i32, %arg0 : i32, i32
  }
}

</mosaic_0001>

<bundles_post_ra>
// kernel: tpu_custom_call.1
= control target key start
LH: loop header
LB: loop body
LE: loop exit
PB: predicated region body
PF: predicated region fallthrough
CT: control target
= control target key end

     0   :  { %10 = vsyncpa [#allocation4], 0  ;;  %s1783_s0 = inlined_call_operand.hbm [shape: f32[8,512], index: 0, kind: input, shape index: {}]   ;;  %s1784_s1 = inlined_call_operand.hbm [shape: f32[8,8], index: 1, kind: input, shape index: {}]   ;;  %s1785_s2 = inlined_call_operand.vmem [shape: f32[8,2], index: 2, kind: input, shape index: {}]   ;;  %s1786_s3 = inlined_call_operand.vmem [shape: f32[24,48], index: 3, kind: input, shape index: {}]   ;;  %s1787_s4 = inlined_call_operand.vmem [shape: f32[8,2], index: 4, kind: input, shape index: {}]   ;;  %s1788_s5 = inlined_call_operand.hbm [shape: f32[8,512], index: 5, kind: output, shape index: {}]  }
   0x1   :  { %12 = vsyncpa [#allocation4 + $0x1], 0 }
   0x2   :  { %13 = vsyncpa [#allocation7], 0 }
   0x3   :  { %14 = vsyncpa [#allocation5], 0 }
   0x4   :  { %16 = vsyncpa [#allocation5 + $0x1], 0  ;;  %s1269_s18 = smov 0   ;;  %s1271_s19 = smov 0  }
   0x5   :  { %s1273_s20 = smov 0   ;;  %s1275_s21 = smov 0  }
   0x6 LB: > { %s1290_s22 = sadd.s32 4294967295, %s1218_s21   ;;  %s950_s23 = sadd.s32 4294967294, %s1218_s21   ;;  %s1218_s21 = sphi %s1275_s21, %s1835_s21   ;;  %s1214_s20 = sphi %s1273_s20, %s1834_s20   ;;  %s1210_s19 = sphi %s1271_s19, %s1833_s19   ;;  %s1206_s18 = sphi %s1269_s18, %s1832_s18  }
   0x7   : > { %p42_p0 = scmp.ne.s32.totalorder %s1210_s19, %s1206_s18  ;;  %p1789_p1 = scmp.eq.s32.totalorder %s1290_s22, 0 }
   0x8   : > { %p156_p3 = scmp.eq.s32.totalorder %s950_s23, 1  ;;  %p951_p5 = scmp.ge.s32.totalorder %s1218_s21, 1 }
   0x9   : > { %p1299_p4 = por %p1789_p1, %p42_p0  ;;  %p163_p7 = scmp.lt.s32.totalorder %s1218_s21, 3 }
   0xa   : > { %p1304_p6 = por %p156_p3, %p42_p0  ;;  %s1220_s27 = smov [#allocation6]  }
   0xb   : > { %s1801_s24 = scalar_select %p1299_p4, 1, 0 }
   0xc   : > { %s1802_s25 = scalar_select %p1304_p6, 1, 0 }
   0xd   : > { %p1309_p8 = pnand %p951_p5, %p163_p7  ;;  %s176_s28 = sshll.u32 %s1220_s27, 4  ;;  %s177_s28 = int_to_ptr.vmem [resolvable:$true] %s176_s28 }
   0xe   : > { %s1317_s29 = sadd.s32 1, %s1218_s21   ;;  %s29_s8 = sadd.s32 1, %s1214_s20 }
   0xf   : > { %s1803_s26 = scalar_select %p1309_p8, 1, 0 }
  0x10   : > { %p1012_p10 = pneg %p1309_p8  ;;  %s26_s6 = ssub.s32 %s1218_s21, %s1317_s29 }
  0x11   : > { %p1327_p12 = scmp.eq.s32.totalorder %s26_s6, 0  ;;  %s1090_s11 = scalar_lea.hbm %s1784_s1, 128 }
  0x12   : > { %p1321_p11 = pnand %p1012_p10, %p1789_p1  ;;  %p1091_p0 = scmp.ne.s32.totalorder %s1784_s1, %s1090_s11 }
  0x13   : > { %s1805_s7 = scalar_select %p1327_p12, 1, 0 }
  0x14   : > { %p1092_p3 = pneg %p1321_p11  ;;  %p1097_p10 = scmp.lt.u32.totalorder %s1090_s11, %s1784_s1 }
  0x16   : > { %p1093_p5 = pnand %p1092_p3, %p1091_p0 }
  0x18   : > { %p1094_p7 = pneg %p1093_p5 }
  0x1a   : > { %p1099_p9 = pnand %p1097_p10, %p1094_p7 }
  0x1c   : > { %1102 = shalt.err (!%p1099_p9)
}
  0x1d   : > { %s1103_s16 = scalar_lea.vmem %s177_s28, 128  ;;  %p1111_p6 = scmp.lt.s32.totalorder %s177_s28, %s177_s28 }
  0x1e   : > { %p1104_p1 = scmp.ne.s32.totalorder %s177_s28, %s1103_s16  ;;  %p1112_p4 = scmp.lt.s32.totalorder %s1103_s16, %s1103_s16 }
  0x20   : > { %p1106_p2 = pnand %p1104_p1, %p1092_p3  ;;  %p1113_p8 = por %p1112_p4, %p1111_p6 }
  0x22   : > { %p1107_p13 = pneg %p1106_p2 }
  0x24   : > { %p1114_p12 = pnand %p1113_p8, %p1107_p13 }
  0x26   : > { %1117 = shalt.err (!%p1114_p12)
}
  0x27   : > { %1015 = dma.hbm_to_vmem [thread:$0]  (!%p1321_p11), %s1784_s1, 128, %s177_s28, [#allocation7]  }
  0x28   : > { %p1806_p1 = scmp.ne.s32.totalorder %s1805_s7, 0  ;;  %p37_p2 = scmp.eq.s32.totalorder %s1218_s21, 0 }
  0x29   : > { %p1807_p4 = scmp.ne.s32.totalorder %s1214_s20, %s1210_s19  ;;  %p1808_p6 = scmp.eq.s32.totalorder %s1290_s22, 1 }
  0x2a   : > { %s1353_s27 = scalar_select %p1806_p1, %s1214_s20, %s29_s8  }
  0x2b   : > { %p1361_p8 = por %p1808_p6, %p1807_p4  ;;  %p1025_p9 = scmp.lt.s32.totalorder %s1218_s21, 2 }
  0x2c   : > { %s196_s6 = sand.u32 1, %s1214_s20   ;;  %p1810_p12 = pmov %p1807_p4 }
  0x2d   : > { %s954_s9 = sshll.u32 %s196_s6, 4  ;;  %s970_s10 = sshll.u32 %s1218_s21, 8 }
  0x2e   : > { %p38_p13 = por %p37_p2, %p1810_p12  ;;  %s1374_s28 = scalar_lea.hbm %s1783_s0, %s970_s10 }
  0x2f   : > { %s200_s7 = scalar_lea.vmem [#allocation3], %s954_s9  ;;  %s197_s14 = scalar_lea.sflag [#allocation4], %s196_s6 }
  0x30   : > { %s208_s8 = sshll.u32 %s200_s7, 4  ;;  %p1376_p11 = pnand %p1025_p9, %p38_p13  ;;  %s1380_s8 = int_to_ptr.vmem [resolvable:$true] %s208_s8 }
  0x31   : > { %s1118_s15 = scalar_lea.hbm %s1374_s28, 256  ;;  %s1123_s23 = scalar_lea.hbm %s1783_s0, 512 }
  0x32   : > { %p1119_p0 = scmp.ne.s32.totalorder %s1374_s28, %s1118_s15  ;;  %p1120_p3 = pneg %p1376_p11 }
  0x33   : > { %p1124_p10 = scmp.lt.u32.totalorder %s1374_s28, %s1783_s0  ;;  %p1125_p1 = scmp.lt.u32.totalorder %s1123_s23, %s1118_s15 }
  0x34   : > { %p1121_p5 = pnand %p1120_p3, %p1119_p0  ;;  %p1127_p4 = scmp.lt.u32.totalorder %s1118_s15, %s1374_s28 }
  0x35   : > { %p1126_p2 = por %p1125_p1, %p1124_p10 }
  0x36   : > { %p1122_p7 = pneg %p1121_p5 }
  0x37   : > { %p1128_p6 = por %p1127_p4, %p1126_p2 }
  0x39   : > { %p1129_p9 = pnand %p1128_p6, %p1122_p7 }
  0x3b   : > { %1132 = shalt.err (!%p1129_p9)
}
  0x3c   : > { %s1133_s6 = scalar_lea.vmem %s1380_s8, 256  ;;  %s1221_s11 = smov [#allocation3]  }
  0x3d   : > { %p1134_p12 = scmp.ne.s32.totalorder %s1380_s8, %s1133_s6  ;;  %s1138_s12 = sshll.u32 %s1221_s11, 4  ;;  %s1139_s12 = int_to_ptr.vmem [resolvable:$false] %s1138_s12 }
  0x3e   : > { %s1140_s7 = scalar_lea.vmem %s1139_s12, 512  ;;  %p1141_p5 = scmp.lt.s32.totalorder %s1380_s8, %s1139_s12 }
  0x3f   : > { %p1136_p13 = pnand %p1134_p12, %p1120_p3  ;;  %p1142_p10 = scmp.lt.s32.totalorder %s1140_s7, %s1133_s6 }
  0x41   : > { %p1137_p0 = pneg %p1136_p13  ;;  %p1143_p1 = por %p1142_p10, %p1141_p5 }
  0x43   : > { %p1144_p2 = pnand %p1143_p1, %p1137_p0 }
  0x45   : > { %1147 = shalt.err (!%p1144_p2)
}
  0x46   : > { %1019 = dma.hbm_to_vmem [thread:$0]  (!%p1376_p11), %s1374_s28, 256, %s1380_s8, %s197_s14  }
  0x47   : > { %p1812_p7 = scmp.ne.s32.totalorder %s1803_s26, 0 }
  0x48   : > { %s1410_s15 = sand.u32 (!%p1812_p7), 1, %s1210_s19   ;;  %p1813_p3 = scmp.ne.s32.totalorder (!%p1812_p7), %s1801_s24, 0 }
  0x49   : > { %217 = sbr.rel (%p1812_p7) target bundleno = 1583 (0x62f), region = 40  ;;  %s958_s16 = sshll.u32 (!%p1812_p7), %s1410_s15, 4 }
  0x4a   : > { %s220_s17 = scalar_lea.sflag (!%p1812_p7), [#allocation4], %s1410_s15  ;;  %s223_s23 = scalar_lea.vmem (!%p1812_p7), [#allocation3], %s958_s16 }
  0x50   : > { %1193 = dma.done.wait (%p1813_p3), %s220_s17, 256  }
  0x51   : > { %1195 = vsyncadd (%p1813_p3), %s220_s17, 4294967040  ;;  %p1814_p11 = scmp.eq.s32.totalorder %s1290_s22, 0 }
  0x53   : > { %1197 = dma.done.wait (%p1814_p11), [#allocation7], 128   ;;  %p1815_p4 = pmov %p1814_p11 }
  0x54   : > { %v1222_v0 = vmov 0.0   ;;  %v1223_v1 = vmov 0   ;;  %v257_v2 = vld [vmem:[%s223_s23 + $0x8] sm:$0xff]  ;;  %v256_v3 = vld [vmem:[%s223_s23] sm:$0xff]  ;;  %vm340_vm0 = vcmask 64512   ;;  %v1224_v6 = vmov 1  }
  0x55   : > { %1199 = vsyncadd (%p1815_p4), [#allocation7], 4294967168  ;;  %408 = vmatprep.mubr.f32.mxu0 %v1222_v0  ;;  %1077 = vset.pattern.permute.xlu0 %v1223_v1  ;;  %v333_v4 = vld [vmem:[#allocation6] sm:$0xff]  ;;  %s1225_s28 = smov 127   ;;  %s1226_s8 = smov 1   ;;  %v258_v17 = vlaneseq  ;;  %vm1792_vm13 = vmmov 1  }
  0x56   : > { %800 = vmatprep.mubr.f32.mxu1 %v1222_v0  ;;  %1089 = vset.pattern.permute.xlu1 %v1223_v1  ;;  %v334_v5 = vld [vmem:[%s1785_s2] sm:$0xff]  ;;  %s1227_s13 = smov 112   ;;  %s1228_s14 = smov 16  }
  0x57   : > { %344 = vmatprep.subr.mxu0 %v257_v2  ;;  %337 = vperm.xlu0 %1077, %v334_v5   ;;  %v1442_v18 = vand.u32 127, %v258_v17  ;;  %s1229_s9 = smov 126   ;;  %s1230_s10 = smov 2  }
  0x58   : > { %345 = vmatpush1.msra.mxu0 %v256_v3  ;;  %s1232_s6 = smov 96   ;;  %s1233_s11 = smov 32  }
  0x59   : > { %961 = vmatmul.mubr.msk.f32.vlgmr.msra.gmra.mrb[0].mxu0 %vm340_vm0, %v333_v4  ;;  %v260_v19 = vadd.s32 128, %v1442_v18  ;;  %v1446_v20 = vand.u32 255, %v1442_v18  ;;  %vm429_vm3 = vcmp.lt.s32.totalorder %v1442_v18, 127  ;;  %vm440_vm6 = vcmp.lt.s32.totalorder %v1442_v18, 1  ;;  %s1234_s12 = smov 125   ;;  %s1235_s7 = smov 3  }
  0x5a   : > { %794 = vmatprep.mubr.f32.mxu0 %v1222_v0  ;;  %vm451_vm9 = vcmp.lt.s32.totalorder %v1442_v18, 112  ;;  %vm1797_vm11 = vcmp.lt.s32.totalorder %v1442_v18, 16  ;;  %vm493_vm0 = vcmp.lt.s32.totalorder %v1442_v18, 126  ;;  %s1236_s17 = smov 80   ;;  %s1237_s23 = smov 48  }
  0x5b   : > { %1078 = vset.pattern.permute.xlu0 %v1224_v6  ;;  %v1448_v21 = vand.u32 255, %v260_v19  ;;  %v1451_v22 = vand.u32 15, %v1446_v20  ;;  %vm1796_vm12 = vcmp.ge.s32.totalorder %v1446_v20, 16  ;;  %s1238_s24 = smov [#allocation8]  }
  0x5c   : > { %418 = vperm.xlu0 %1078, %v334_v5   ;;  %s1152_s26 = sshll.u32 %s1238_s24, 4  ;;  %s1153_s26 = int_to_ptr.vmem [resolvable:$false] %s1152_s26 }
  0x5d   : > { %v1454_v23 = vand.u32 15, %v1448_v21  ;;  %vm1799_vm4 = vcmp.lt.s32.totalorder %v1451_v22, 15  ;;  %vm1798_vm7 = vcmp.ge.s32.totalorder %v1451_v22, 1  ;;  %vm1795_vm10 = vcmp.lt.s32.totalorder %v1448_v21, 240 }
  0x5e   : > { %vm984_vm15 = vmpackc.low %vm1792_vm13, %vm1798_vm7 }
  0x5f   : > { %vm310_vm5 = vcmp.lt.s32.totalorder %v1454_v23, 15  ;;  %vm1800_vm8 = vcmp.ge.s32.totalorder %v1454_v23, 1 }
  0x60   : > { %vm981_vm14 = vmpackc.low %vm1792_vm13, %vm1800_vm8  ;;  %vm1794_vm13 = vcmp.ge.s32.totalorder %v1454_v23, 2 }
  0xd6   : > { %v338_v7 = vpop.permute.xlu0 %337 }
  0xdb   : > { %v419_v9 = vpop.permute.xlu0 %418 }
 0x12c   : > { %v410_v8 = vpop.f32.mrb[0].mxu0 }
 0x12d   : > { %v411_v10 = vadd.f32 %v410_v8, %v338_v7  ;;  %v412_v11 = vpop.f32.mrb[1].mxu0 }
 0x12e   : > { %v413_v12 = vadd.f32 %v412_v11, %v338_v7 }
 0x12f   : > { %vm415_vm1 = vcmp.ge.f32.partialorder %v411_v10, 0.0  ;;  %v421_v13 = vmul.f32 %v419_v9, %v411_v10 }
 0x130   : > { %vm416_vm2 = vcmp.ge.f32.partialorder %v413_v12, 0.0  ;;  %v422_v14 = vmul.f32 %v419_v9, %v413_v12 }
 0x131   : > { %v1430_v15 = vsel %vm415_vm1, %v411_v10, %v421_v13  ;;  %vm317_vm1 = vcmp.lt.s32.totalorder %v1451_v22, 14 }
 0x132   : > { %425 = vrot.lane.b32.xlu1 %v1430_v15, %s1225_s28  ;;  %v1434_v16 = vsel %vm416_vm2, %v413_v12, %v422_v14  ;;  %vm318_vm2 = vcmp.lt.s32.totalorder %v1454_v23, 14 }
 0x133   : > { %438 = vrot.lane.b32.xlu0 %v1434_v16, %s1226_s8 }
 0x136   : > { %427 = vrot.lane.b32.xlu1 %v1434_v16, %s1225_s28 }
 0x13a   : > { %436 = vrot.lane.b32.xlu1 %v1430_v15, %s1226_s8 }
 0x1a4   : > { %v426_v24 = vpop.permute.xlu1 %425 }
 0x1a5   : > { %v439_v30 = vpop.permute.xlu0 %438 }
 0x1a8   : > { %v428_v25 = vpop.permute.xlu1 %427 }
 0x1a9   : > { %v430_v26 = vsel %vm429_vm3, %v426_v24, %v428_v25  ;;  %v431_v27 = vsel %vm429_vm3, %v428_v25, %v426_v24 }
 0x1aa   : > { %v432_v28 = vsel %vm1799_vm4, %v430_v26, 0.0  ;;  %v433_v29 = vsel %vm310_vm5, %v431_v27, 0.0 }
 0x1ab   : > { %v434_v32 = vadd.f32 %v432_v28, %v1430_v15  ;;  %v435_v33 = vadd.f32 %v433_v29, %v1434_v16 }
 0x1ac   : > { %v437_v31 = vpop.permute.xlu1 %436 }
 0x1ad   : > { %v441_v34 = vsel %vm440_vm6, %v437_v31, %v439_v30  ;;  %v442_v35 = vsel %vm440_vm6, %v439_v30, %v437_v31 }
 0x1ae   : > { %v443_v36 = vsel %vm1798_vm7, %v442_v35, 0.0  ;;  %v444_v37 = vsel %vm1800_vm8, %v441_v34, 0.0 }
 0x1af   : > { %v445_v38 = vadd.f32 %v443_v36, %v434_v32  ;;  %v446_v39 = vadd.f32 %v444_v37, %v435_v33 }
 0x1b1   : > { %447 = vrot.lane.b32.xlu1 %v445_v38, %s1227_s13  ;;  %449 = vrot.lane.b32.xlu0 %v446_v39, %s1227_s13 }
 0x1b5   : > { %458 = vrot.lane.b32.xlu1 %v445_v38, %s1228_s14  ;;  %460 = vrot.lane.b32.xlu0 %v446_v39, %s1228_s14 }
 0x223   : > { %v448_v40 = vpop.permute.xlu1 %447  ;;  %v450_v41 = vpop.permute.xlu0 %449 }
 0x224   : > { %v453_v42 = vsel %vm451_vm9, %v450_v41, %v448_v40  ;;  %v452_v43 = vsel %vm451_vm9, %v448_v40, %v450_v41 }
 0x225   : > { %v455_v44 = vsel %vm1795_vm10, %v453_v42, 0.0  ;;  %v456_v48 = vadd.f32 %v452_v43, %v445_v38 }
 0x226   : > { %v457_v45 = vadd.f32 %v455_v44, %v446_v39 }
 0x227   : > { %v459_v46 = vpop.permute.xlu1 %458  ;;  %v461_v47 = vpop.permute.xlu0 %460 }
 0x228   : > { %v463_v49 = vsel %vm1797_vm11, %v459_v46, %v461_v47  ;;  %v464_v50 = vsel %vm1797_vm11, %v461_v47, %v459_v46 }
 0x229   : > { %v465_v51 = vsel %vm1796_vm12, %v464_v50, 0.0  ;;  %v468_v52 = vadd.f32 %v463_v49, %v457_v45 }
 0x22a   : > { %v467_v53 = vadd.f32 %v465_v51, %v456_v48 }
 0x22b   : > { %471 = vrot.lane.b32.xlu0 %v468_v52, %s1226_s8 }
 0x22c   : > { %469 = vrot.lane.b32.xlu1 %v467_v53, %s1226_s8 }
 0x22f   : > { %479 = vrot.lane.b32.xlu0 %v468_v52, %s1225_s28 }
 0x230   : > { %477 = vrot.lane.b32.xlu1 %v467_v53, %s1225_s28 }
 0x233   : > { %491 = vrot.lane.b32.xlu0 %v468_v52, %s1229_s9 }
 0x234   : > { %489 = vrot.lane.b32.xlu1 %v467_v53, %s1229_s9 }
 0x237   : > { %502 = vrot.lane.b32.xlu0 %v468_v52, %s1230_s10 }
 0x238   : > { %500 = vrot.lane.b32.xlu1 %v467_v53, %s1230_s10 }
 0x29d   : > { %v472_v54 = vpop.permute.xlu0 %471 }
 0x29e   : > { %v470_v55 = vpop.permute.xlu1 %469 }
 0x29f   : > { %v473_v56 = vsel %vm440_vm6, %v470_v55, %v472_v54  ;;  %v474_v57 = vsel %vm440_vm6, %v472_v54, %v470_v55 }
 0x2a0   : > { %v980_v58 = vpack.c.bf16 %v468_v52, %v473_v56  ;;  %v983_v59 = vpack.c.bf16 %v467_v53, %v474_v57  ;;  %v475_v1 = vsel %vm1798_vm7, %v474_v57, 0.0  ;;  %v476_v2 = vsel %vm1800_vm8, %v473_v56, 0.0 }
 0x2a1   : > { %v480_v60 = vpop.permute.xlu0 %479  ;;  %v485_v7 = vadd.f32 %v475_v1, %v467_v53  ;;  %v486_v8 = vadd.f32 %v476_v2, %v468_v52 }
 0x2a2   : > { %v478_v61 = vpop.permute.xlu1 %477  ;;  %982 = vmatprep.subr.msk.bf16.mxu0 %vm981_vm14, %v980_v58  ;;  %998 = vmatprep.subr.msk.bf16.mxu1 %vm981_vm14, %v980_v58  ;;  %vm504_vm14 = vcmp.lt.s32.totalorder %v1442_v18, 2 }
 0x2a3   : > { %v1520_v62 = vsel %vm429_vm3, %v478_v61, %v480_v60  ;;  %v1524_v63 = vsel %vm429_vm3, %v480_v60, %v478_v61  ;;  %985 = vmatpush1.bf16.msk.msra.mxu0 %vm984_vm15, %v983_v59  ;;  %1001 = vmatpush1.bf16.msk.msra.mxu1 %vm984_vm15, %v983_v59  ;;  %vm319_vm15 = vcmp.ge.s32.totalorder %v1451_v22, 2 }
 0x2a4   : > { %v483_v4 = vsel %vm1799_vm4, %v1520_v62, 0.0  ;;  %v484_v5 = vsel %vm310_vm5, %v1524_v63, 0.0 }
 0x2a5   : > { %v492_v3 = vpop.permute.xlu0 %491  ;;  %v487_v13 = vadd.f32 %v485_v7, %v483_v4  ;;  %v488_v14 = vadd.f32 %v486_v8, %v484_v5 }
 0x2a6   : > { %v490_v6 = vpop.permute.xlu1 %489 }
 0x2a7   : > { %v494_v9 = vsel %vm493_vm0, %v490_v6, %v492_v3  ;;  %v495_v10 = vsel %vm493_vm0, %v492_v3, %v490_v6 }
 0x2a8   : > { %v496_v11 = vsel %vm317_vm1, %v494_v9, 0.0  ;;  %v497_v12 = vsel %vm318_vm2, %v495_v10, 0.0 }
 0x2a9   : > { %v503_v17 = vpop.permute.xlu0 %502  ;;  %v498_v24 = vadd.f32 %v496_v11, %v487_v13  ;;  %v499_v25 = vadd.f32 %v497_v12, %v488_v14 }
 0x2aa   : > { %v501_v19 = vpop.permute.xlu1 %500 }
 0x2ab   : > { %v505_v26 = vsel %vm504_vm14, %v501_v19, %v503_v17  ;;  %v506_v27 = vsel %vm504_vm14, %v503_v17, %v501_v19 }
 0x2ac   : > { %v507_v28 = vsel %vm319_vm15, %v506_v27, 0.0  ;;  %v508_v29 = vsel %vm1794_vm13, %v505_v26, 0.0  ;;  %vm535_vm13 = vcmp.lt.s32.totalorder %v1442_v18, 96 }
 0x2ad   : > { %v509_v30 = vadd.f32 %v507_v28, %v498_v24  ;;  %v510_v31 = vadd.f32 %v508_v29, %v499_v25 }
 0x2af   : > { %511 = vrot.lane.b32.xlu1 %v509_v30, %s1227_s13  ;;  %513 = vrot.lane.b32.xlu0 %v510_v31, %s1227_s13 }
 0x2b3   : > { %521 = vrot.lane.b32.xlu1 %v509_v30, %s1228_s14  ;;  %523 = vrot.lane.b32.xlu0 %v510_v31, %s1228_s14 }
 0x2b7   : > { %531 = vrot.lane.b32.xlu1 %v509_v30, %s1232_s6  ;;  %533 = vrot.lane.b32.xlu0 %v510_v31, %s1232_s6 }
 0x2bb   : > { %542 = vrot.lane.b32.xlu1 %v509_v30, %s1233_s11  ;;  %544 = vrot.lane.b32.xlu0 %v510_v31, %s1233_s11 }
 0x321   : > { %v512_v32 = vpop.permute.xlu1 %511  ;;  %v514_v33 = vpop.permute.xlu0 %513 }
 0x322   : > { %v516_v34 = vsel %vm451_vm9, %v514_v33, %v512_v32  ;;  %v515_v36 = vsel %vm451_vm9, %v512_v32, %v514_v33 }
 0x323   : > { %v518_v35 = vsel %vm1795_vm10, %v516_v34, 0.0  ;;  %v519_v43 = vadd.f32 %v515_v36, %v509_v30  ;;  %vm322_vm10 = vcmp.lt.s32.totalorder %v1448_v21, 224 }
 0x324   : > { %v520_v39 = vadd.f32 %v518_v35, %v510_v31 }
 0x325   : > { %v522_v37 = vpop.permute.xlu1 %521  ;;  %v524_v38 = vpop.permute.xlu0 %523 }
 0x326   : > { %v526_v40 = vsel %vm1797_vm11, %v524_v38, %v522_v37  ;;  %v525_v41 = vsel %vm1797_vm11, %v522_v37, %v524_v38  ;;  %vm323_vm11 = vcmp.ge.s32.totalorder %v1446_v20, 32 }
 0x327   : > { %v527_v42 = vsel %vm1796_vm12, %v526_v40, 0.0  ;;  %v530_v47 = vadd.f32 %v525_v41, %v520_v39  ;;  %vm546_vm12 = vcmp.lt.s32.totalorder %v1442_v18, 32 }
 0x328   : > { %v529_v46 = vadd.f32 %v527_v42, %v519_v43 }
 0x329   : > { %v532_v44 = vpop.permute.xlu1 %531  ;;  %v534_v45 = vpop.permute.xlu0 %533 }
 0x32a   : > { %v537_v48 = vsel %vm535_vm13, %v534_v45, %v532_v44  ;;  %v536_v49 = vsel %vm535_vm13, %v532_v44, %v534_v45 }
 0x32b   : > { %v539_v50 = vsel %vm322_vm10, %v537_v48, 0.0  ;;  %v540_v54 = vadd.f32 %v536_v49, %v529_v46 }
 0x32c   : > { %v541_v51 = vadd.f32 %v539_v50, %v530_v47 }
 0x32d   : > { %v543_v52 = vpop.permute.xlu1 %542  ;;  %v545_v53 = vpop.permute.xlu0 %544 }
 0x32e   : > { %v547_v55 = vsel %vm546_vm12, %v543_v52, %v545_v53  ;;  %v548_v56 = vsel %vm546_vm12, %v545_v53, %v543_v52 }
 0x32f   : > { %v549_v57 = vsel %vm323_vm11, %v548_v56, 0.0  ;;  %v552_v58 = vadd.f32 %v547_v55, %v541_v51 }
 0x330   : > { %v551_v59 = vadd.f32 %v549_v57, %v540_v54 }
 0x331   : > { %555 = vrot.lane.b32.xlu0 %v552_v58, %s1225_s28 }
 0x332   : > { %553 = vrot.lane.b32.xlu1 %v551_v59, %s1225_s28 }
 0x335   : > { %565 = vrot.lane.b32.xlu0 %v552_v58, %s1226_s8 }
 0x336   : > { %563 = vrot.lane.b32.xlu1 %v551_v59, %s1226_s8 }
 0x339   : > { %575 = vrot.lane.b32.xlu0 %v552_v58, %s1229_s9 }
 0x33a   : > { %573 = vrot.lane.b32.xlu1 %v551_v59, %s1229_s9 }
 0x33d   : > { %585 = vrot.lane.b32.xlu0 %v552_v58, %s1230_s10 }
 0x33e   : > { %583 = vrot.lane.b32.xlu1 %v551_v59, %s1230_s10 }
 0x341   : > { %595 = vrot.lane.b32.xlu0 %v552_v58, %s1234_s12 }
 0x342   : > { %593 = vrot.lane.b32.xlu1 %v551_v59, %s1234_s12 }
 0x345   : > { %606 = vrot.lane.b32.xlu0 %v552_v58, %s1235_s7 }
 0x346   : > { %604 = vrot.lane.b32.xlu1 %v551_v59, %s1235_s7 }
 0x3a3   : > { %v556_v60 = vpop.permute.xlu0 %555 }
 0x3a4   : > { %v554_v61 = vpop.permute.xlu1 %553 }
 0x3a5   : > { %v557_v3 = vsel %vm429_vm3, %v554_v61, %v556_v60  ;;  %v558_v4 = vsel %vm429_vm3, %v556_v60, %v554_v61 }
 0x3a6   : > { %v559_v9 = vsel %vm1799_vm4, %v557_v3, 0.0  ;;  %v560_v10 = vsel %vm310_vm5, %v558_v4, 0.0  ;;  %vm326_vm4 = vcmp.lt.s32.totalorder %v1454_v23, 13 }
 0x3a7   : > { %v566_v1 = vpop.permute.xlu0 %565  ;;  %v561_v24 = vadd.f32 %v559_v9, %v551_v59  ;;  %v562_v25 = vadd.f32 %v560_v10, %v552_v58 }
 0x3a8   : > { %v564_v2 = vpop.permute.xlu1 %563 }
 0x3a9   : > { %v567_v7 = vsel %vm440_vm6, %v564_v2, %v566_v1  ;;  %v568_v8 = vsel %vm440_vm6, %v566_v1, %v564_v2 }
 0x3aa   : > { %v569_v14 = vsel %vm1798_vm7, %v568_v8, 0.0  ;;  %v570_v17 = vsel %vm1800_vm8, %v567_v7, 0.0  ;;  %vm325_vm7 = vcmp.lt.s32.totalorder %v1451_v22, 13  ;;  %vm328_vm8 = vcmp.ge.s32.totalorder %v1454_v23, 3 }
 0x3ab   : > { %v576_v5 = vpop.permute.xlu0 %575  ;;  %v571_v30 = vadd.f32 %v569_v14, %v561_v24  ;;  %v572_v31 = vadd.f32 %v570_v17, %v562_v25 }
 0x3ac   : > { %v574_v6 = vpop.permute.xlu1 %573 }
 0x3ad   : > { %v577_v11 = vsel %vm493_vm0, %v574_v6, %v576_v5  ;;  %v578_v12 = vsel %vm493_vm0, %v576_v5, %v574_v6  ;;  %vm597_vm0 = vcmp.lt.s32.totalorder %v1442_v18, 125 }
 0x3ae   : > { %v579_v28 = vsel %vm317_vm1, %v577_v11, 0.0  ;;  %v580_v29 = vsel %vm318_vm2, %v578_v12, 0.0  ;;  %vm608_vm1 = vcmp.lt.s32.totalorder %v1442_v18, 3  ;;  %vm327_vm2 = vcmp.ge.s32.totalorder %v1451_v22, 3 }
 0x3af   : > { %v586_v13 = vpop.permute.xlu0 %585  ;;  %v581_v36 = vadd.f32 %v579_v28, %v571_v30  ;;  %v582_v37 = vadd.f32 %v580_v29, %v572_v31 }
 0x3b0   : > { %v584_v19 = vpop.permute.xlu1 %583 }
 0x3b1   : > { %v587_v26 = vsel %vm504_vm14, %v584_v19, %v586_v13  ;;  %v588_v27 = vsel %vm504_vm14, %v586_v13, %v584_v19  ;;  %vm1816_vm14 = vcmp.ge.s32.totalorder %v1454_v23, 2 }
 0x3b2   : > { %v589_v33 = vsel %vm319_vm15, %v588_v27, 0.0  ;;  %v590_v34 = vsel %vm1816_vm14, %v587_v26, 0.0  ;;  %vm1820_vm15 = vcmp.ge.s32.totalorder %v1446_v20, 16 }
 0x3b3   : > { %v596_v32 = vpop.permute.xlu0 %595  ;;  %v591_v42 = vadd.f32 %v589_v33, %v581_v36  ;;  %v592_v43 = vadd.f32 %v590_v34, %v582_v37 }
 0x3b4   : > { %v594_v35 = vpop.permute.xlu1 %593 }
 0x3b5   : > { %v598_v38 = vsel %vm597_vm0, %v594_v35, %v596_v32  ;;  %v599_v39 = vsel %vm597_vm0, %v596_v32, %v594_v35  ;;  %vm659_vm0 = vcmp.lt.s32.totalorder %v1442_v18, 80 }
 0x3b6   : > { %v600_v40 = vsel %vm325_vm7, %v598_v38, 0.0  ;;  %v601_v41 = vsel %vm326_vm4, %v599_v39, 0.0  ;;  %vm1817_vm4 = vcmp.lt.s32.totalorder %v1448_v21, 240  ;;  %vm1818_vm7 = vcmp.lt.s32.totalorder %v1442_v18, 16 }
 0x3b7   : > { %v607_v44 = vpop.permute.xlu0 %606  ;;  %v602_v46 = vadd.f32 %v600_v40, %v591_v42  ;;  %v603_v47 = vadd.f32 %v601_v41, %v592_v43  ;;  %v833_v43 = vld [vmem:[%s1787_s4] sm:$0xff] }
 0x3b8   : > { %v605_v45 = vpop.permute.xlu1 %604 }
 0x3b9   : > { %v609_v48 = vsel %vm608_vm1, %v605_v45, %v607_v44  ;;  %v610_v49 = vsel %vm608_vm1, %v607_v44, %v605_v45  ;;  %vm1822_vm1 = vcmp.lt.s32.totalorder %v1451_v22, 15 }
 0x3ba   : > { %v611_v50 = vsel %vm327_vm2, %v610_v49, 0.0  ;;  %v612_v51 = vsel %vm328_vm8, %v609_v48, 0.0  ;;  %vm1819_vm8 = vmmov %vm1818_vm7  ;;  %vm1823_vm2 = vcmp.ge.s32.totalorder %v1451_v22, 1  ;;  %v707_v22 = vld [vmem:[%s1786_s3 + $0x10] sm:$0xff] }
 0x3bb   : > { %v613_v52 = vadd.f32 %v611_v50, %v602_v46  ;;  %v614_v53 = vadd.f32 %v612_v51, %v603_v47 }
 0x3bd   : > { %615 = vrot.lane.b32.xlu1 %v613_v52, %s1227_s13  ;;  %617 = vrot.lane.b32.xlu0 %v614_v53, %s1227_s13 }
 0x3c1   : > { %625 = vrot.lane.b32.xlu1 %v613_v52, %s1228_s14  ;;  %627 = vrot.lane.b32.xlu0 %v614_v53, %s1228_s14 }
 0x3c5   : > { %635 = vrot.lane.b32.xlu1 %v613_v52, %s1232_s6  ;;  %637 = vrot.lane.b32.xlu0 %v614_v53, %s1232_s6 }
 0x3c9   : > { %645 = vrot.lane.b32.xlu1 %v613_v52, %s1233_s11  ;;  %647 = vrot.lane.b32.xlu0 %v614_v53, %s1233_s11 }
 0x3cd   : > { %655 = vrot.lane.b32.xlu1 %v613_v52, %s1236_s17  ;;  %657 = vrot.lane.b32.xlu0 %v614_v53, %s1236_s17 }
 0x3d1   : > { %666 = vrot.lane.b32.xlu1 %v613_v52, %s1237_s23  ;;  %668 = vrot.lane.b32.xlu0 %v614_v53, %s1237_s23 }
 0x42f   : > { %v616_v54 = vpop.permute.xlu1 %615  ;;  %v618_v55 = vpop.permute.xlu0 %617 }
 0x430   : > { %v620_v56 = vsel %vm451_vm9, %v618_v55, %v616_v54  ;;  %v619_v61 = vsel %vm451_vm9, %v616_v54, %v618_v55 }
 0x431   : > { %v622_v57 = vsel %vm1817_vm4, %v620_v56, 0.0  ;;  %v623_v6 = vadd.f32 %v619_v61, %v613_v52  ;;  %vm990_vm4 = vmpackc.low %vm1823_vm2, %vm1822_vm1 }
 0x432   : > { %v624_v1 = vadd.f32 %v622_v57, %v614_v53 }
 0x433   : > { %v626_v58 = vpop.permute.xlu1 %625  ;;  %v628_v59 = vpop.permute.xlu0 %627 }
 0x434   : > { %v630_v60 = vsel %vm1818_vm7, %v628_v59, %v626_v58  ;;  %v629_v2 = vsel %vm1819_vm8, %v626_v58, %v628_v59  ;;  %vm1824_vm7 = vmmov 1  }
 0x435   : > { %v631_v3 = vsel %vm1820_vm15, %v630_v60, 0.0  ;;  %v634_v10 = vadd.f32 %v629_v2, %v624_v1  ;;  %vm993_vm8 = vmpackc.low %vm310_vm5, %vm1824_vm7 }
 0x436   : > { %v633_v9 = vadd.f32 %v631_v3, %v623_v6 }
 0x437   : > { %v636_v4 = vpop.permute.xlu1 %635  ;;  %v638_v5 = vpop.permute.xlu0 %637 }
 0x438   : > { %v640_v7 = vsel %vm535_vm13, %v638_v5, %v636_v4  ;;  %v639_v11 = vsel %vm535_vm13, %v636_v4, %v638_v5  ;;  %vm670_vm13 = vcmp.lt.s32.totalorder %v1442_v18, 48 }
 0x439   : > { %v642_v8 = vsel %vm322_vm10, %v640_v7, 0.0  ;;  %v643_v25 = vadd.f32 %v639_v11, %v633_v9  ;;  %vm330_vm10 = vcmp.lt.s32.totalorder %v1448_v21, 208 }
 0x43a   : > { %v644_v14 = vadd.f32 %v642_v8, %v634_v10 }
 0x43b   : > { %v646_v12 = vpop.permute.xlu1 %645  ;;  %v648_v13 = vpop.permute.xlu0 %647 }
 0x43c   : > { %v650_v17 = vsel %vm546_vm12, %v648_v13, %v646_v12  ;;  %v649_v19 = vsel %vm546_vm12, %v646_v12, %v648_v13  ;;  %vm331_vm12 = vcmp.ge.s32.totalorder %v1446_v20, 48 }
 0x43d   : > { %v651_v24 = vsel %vm323_vm11, %v650_v17, 0.0  ;;  %v654_v29 = vadd.f32 %v649_v19, %v644_v14  ;;  %vm1821_vm11 = vcmp.ge.s32.totalorder %v1454_v23, 1  ;;  %v705_v23 = vld [vmem:[%s1786_s3] sm:$0xff] }
 0x43e   : > { %v653_v28 = vadd.f32 %v651_v24, %v643_v25  ;;  %vm987_vm14 = vmpackc.low %vm1821_vm11, %vm310_vm5  ;;  %vm720_vm5 = vcmask 392192  }
 0x43f   : > { %v656_v26 = vpop.permute.xlu1 %655  ;;  %v658_v27 = vpop.permute.xlu0 %657 }
 0x440   : > { %v661_v30 = vsel %vm659_vm0, %v658_v27, %v656_v26  ;;  %v660_v31 = vsel %vm659_vm0, %v656_v26, %v658_v27 }
 0x441   : > { %v663_v32 = vsel %vm330_vm10, %v661_v30, 0.0  ;;  %v664_v36 = vadd.f32 %v660_v31, %v653_v28  ;;  %vm1828_vm10 = vcmp.ge.s32.totalorder %v1446_v20, 16 }
 0x442   : > { %v665_v33 = vadd.f32 %v663_v32, %v654_v29 }
 0x443   : > { %v667_v34 = vpop.permute.xlu1 %666  ;;  %v669_v35 = vpop.permute.xlu0 %668 }
 0x444   : > { %v671_v37 = vsel %vm670_vm13, %v667_v34, %v669_v35  ;;  %v672_v38 = vsel %vm670_vm13, %v669_v35, %v667_v34  ;;  %vm1829_vm13 = vcmp.lt.s32.totalorder %v1448_v21, 240 }
 0x445   : > { %v673_v39 = vsel %vm331_vm12, %v672_v38, 0.0  ;;  %v676_v40 = vadd.f32 %v671_v37, %v665_v33 }
 0x446   : > { %v675_v41 = vadd.f32 %v673_v39, %v664_v36 }
 0x448   : > { %v1084_v42 = vpack.i.bf16 %v676_v40, %v675_v41 }
 0x44a   : > { %1085 = vrot.lane.b32.xlu0 %v1084_v42, %s1225_s28  ;;  %1080 = vrot.lane.b32.xlu1 %v1084_v42, %s1226_s8  ;;  %s1154_s28 = scalar_lea.vmem %s1153_s26, 512 }
 0x44e   : > { %844 = vperm.xlu0 %1078, %v833_v43   ;;  %836 = vperm.xlu1 %1089, %v833_v43  }
 0x4bc   : > { %v1086_v44 = vpop.permute.xlu0 %1085  ;;  %v1081_v45 = vpop.permute.xlu1 %1080 }
 0x4bd   : > { %v1088_v46 = vunpack.i.h.bf16 %v1086_v44  ;;  %v1087_v47 = vunpack.i.l.bf16 %v1086_v44  ;;  %v1083_v48 = vunpack.i.h.bf16 %v1081_v45  ;;  %v1082_v49 = vunpack.i.l.bf16 %v1081_v45 }
 0x4bf   : > { %v700_v50 = vsel %vm429_vm3, %v1088_v46, %v1087_v47  ;;  %v687_v51 = vsel %vm440_vm6, %v1082_v49, %v1083_v48  ;;  %v688_v52 = vsel %vm440_vm6, %v1083_v48, %v1082_v49  ;;  %v699_v55 = vsel %vm429_vm3, %v1087_v47, %v1088_v46  ;;  %vm1825_vm6 = vmmov %vm1822_vm1 }
 0x4c0   : > { %v986_v53 = vpack.c.bf16 %v687_v51, %v1524_v63  ;;  %v989_v54 = vpack.c.bf16 %v688_v52, %v1520_v62  ;;  %v992_v56 = vpack.c.bf16 %v700_v50, %v676_v40  ;;  %vm996_vm15 = vmpackc.low %vm1825_vm6, %vm1824_vm7  ;;  %v995_v62 = vpack.c.bf16 %v699_v55, %v675_v41  ;;  %v706_v63 = vld [vmem:[%s1786_s3 + $0x8] sm:$0xff] }
 0x4c1   : > { %vm1826_vm3 = vcmp.lt.s32.totalorder %v1442_v18, 16 }
 0x4c2   : > { %988 = vmatprep.subr.msk.bf16.mxu0 %vm987_vm14, %v986_v53  ;;  %999 = vmatprep.subr.msk.bf16.mxu1 %vm987_vm14, %v986_v53  ;;  %vm1827_vm0 = vmmov %vm1826_vm3 }
 0x4c3   : > { %991 = vmatpush1.bf16.msk.msra.mxu0 %vm990_vm4, %v989_v54  ;;  %1002 = vmatpush1.bf16.msk.msra.mxu1 %vm990_vm4, %v989_v54 }
 0x4c4   : > { %994 = vmatprep.subr.msk.bf16.mxu0 %vm993_vm8, %v992_v56  ;;  %1000 = vmatprep.subr.msk.bf16.mxu1 %vm993_vm8, %v992_v56 }
 0x4c7   : > { %997 = vmatpush1.bf16.msk.msra.mxu0 %vm996_vm15, %v995_v62  ;;  %1003 = vmatpush1.bf16.msk.msra.mxu1 %vm996_vm15, %v995_v62 }
 0x4ca   : > { %962 = vmatmul.mubr.msk.f32.vlgmr.msra.gmra.mrb[2].mxu0 %vm720_vm5, %v705_v23  ;;  %963 = vmatmul.mubr.msk.f32.vlgmr.msra.gmra.mrb[0].mxu1 %vm720_vm5, %v706_v63 }
 0x4cb   : > { %806 = vmatprep.mubr.f32.mxu1 %v1222_v0 }
 0x4cd   : > { %v837_v0 = vpop.permute.xlu1 %836  ;;  %v845_v2 = vpop.permute.xlu0 %844 }
 0x4ce   : > { %964 = vmatmul.mubr.msk.f32.gmra.mrb[2].mxu1 %vm720_vm5, %v707_v22 }
 0x59d   : > { %v796_v57 = vpop.f32.mrb[2].mxu0  ;;  %v802_v58 = vpop.f32.mrb[0].mxu1 }
 0x59e   : > { %v804_v59 = vpop.f32.mrb[1].mxu1  ;;  %813 = vrot.lane.b32.xlu0 %v796_v57, %s1228_s14  ;;  %v798_v60 = vpop.f32.mrb[3].mxu0 }
 0x59f   : > { %815 = vrot.lane.b32.xlu1 %v798_v60, %s1228_s14  ;;  %s253_s14 = scalar_lea.vmem [#allocation8], %s958_s16 }
 0x5a0   : > { %s870_s12 = sshll.u32 %s253_s14, 4  ;;  %s1741_s12 = int_to_ptr.vmem [resolvable:$true] %s870_s12 }
 0x5a1   : > { %v808_v61 = vpop.f32.mrb[2].mxu1  ;;  %s1148_s16 = scalar_lea.vmem %s1741_s12, 256  ;;  %p1155_p13 = scmp.lt.s32.totalorder %s1741_s12, %s1153_s26 }
 0x5a2   : > { %v810_v1 = vpop.f32.mrb[3].mxu1  ;;  %p1149_p6 = scmp.ne.s32.totalorder %s1741_s12, %s1148_s16  ;;  %p1156_p0 = scmp.lt.s32.totalorder %s1154_s28, %s1148_s16 }
 0x5a3   : > { %825 = vrot.lane.b32.xlu0 %v810_v1, %s1227_s13  ;;  %823 = vrot.lane.b32.xlu1 %v808_v61, %s1227_s13  ;;  %s971_s13 = sshll.u32 %s1290_s22, 8  ;;  %s856_s22 = scalar_lea.sflag [#allocation5], %s1410_s15 }
 0x5a4   : > { %s1739_s23 = scalar_lea.hbm %s1788_s5, %s971_s13  ;;  %p1150_p9 = pnand %p1149_p6, %p1361_p8 }
 0x5a5   : > { %p1157_p5 = por %p1156_p0, %p1155_p13 }
 0x5a6   : > { %p1151_p12 = pneg %p1150_p9 }
 0x5a8   : > { %p1158_p10 = pnand %p1157_p5, %p1151_p12 }
 0x610   : > { %v814_v3 = vpop.permute.xlu0 %813 }
 0x611   : > { %v816_v4 = vpop.permute.xlu1 %815 }
 0x612   : > { %v818_v5 = vsel %vm1826_vm3, %v816_v4, %v814_v3  ;;  %v817_v6 = vsel %vm1827_vm0, %v814_v3, %v816_v4 }
 0x613   : > { %v819_v7 = vsel %vm1828_vm10, %v818_v5, 0.0  ;;  %v822_v11 = vadd.f32 %v817_v6, %v804_v59 }
 0x614   : > { %v821_v8 = vadd.f32 %v819_v7, %v802_v58 }
 0x615   : > { %v826_v9 = vpop.permute.xlu0 %825  ;;  %v824_v10 = vpop.permute.xlu1 %823 }
 0x616   : > { %v827_v12 = vsel %vm451_vm9, %v824_v10, %v826_v9  ;;  %v828_v13 = vsel %vm451_vm9, %v826_v9, %v824_v10 }
 0x617   : > { %v830_v14 = vsel %vm1829_vm13, %v828_v13, 0.0  ;;  %v831_v17 = vadd.f32 %v827_v12, %v821_v8 }
 0x618   : > { %v832_v19 = vadd.f32 %v830_v14, %v822_v11 }
 0x619   : > { %v839_v24 = vadd.f32 %v837_v0, %v831_v17 }
 0x61a   : > { %v840_v20 = vadd.f32 %v837_v0, %v832_v19 }
 0x61b   : > { %vm841_vm12 = vcmp.ge.f32.partialorder %v839_v24, 0.0  ;;  %v847_v25 = vmul.f32 %v845_v2, %v839_v24 }
 0x61c   : > { %vm842_vm11 = vcmp.ge.f32.partialorder %v840_v20, 0.0  ;;  %v848_v26 = vmul.f32 %v845_v2, %v840_v20 }
 0x61d   : > { %v849_v27 = vsel %vm841_vm12, %v839_v24, %v847_v25 }
 0x61e   : > { %v850_v18 = vsel %vm842_vm11, %v840_v20, %v848_v26  ;;  %v851_v28 = vmul.f32 %v849_v27, %v1430_v15 }
 0x61f   : > { %v852_v21 = vmul.f32 %v850_v18, %v1434_v16 }
 0x620   : > { %853 = vst [vmem:[%s253_s14] sm:$0xff] %v851_v28 }
 0x621   : > { %854 = vst [vmem:[%s253_s14 + $0x8] sm:$0xff] %v852_v21 }
 0x622   : > { %1161 = shalt.err (!%p1158_p10)
}
 0x623   : > { %s1162_s15 = scalar_lea.hbm %s1739_s23, 256  ;;  %s1166_s10 = scalar_lea.hbm %s1788_s5, 512 }
 0x624   : > { %p1163_p1 = scmp.ne.s32.totalorder %s1739_s23, %s1162_s15  ;;  %p1167_p3 = scmp.lt.u32.totalorder %s1739_s23, %s1788_s5 }
 0x625   : > { %p1168_p11 = scmp.lt.u32.totalorder %s1166_s10, %s1162_s15  ;;  %p1170_p6 = scmp.lt.u32.totalorder %s1162_s15, %s1739_s23 }
 0x626   : > { %p1164_p2 = pnand %p1163_p1, %p1361_p8 }
 0x627   : > { %p1169_p4 = por %p1168_p11, %p1167_p3 }
 0x628   : > { %p1165_p7 = pneg %p1164_p2 }
 0x629   : > { %p1171_p9 = por %p1170_p6, %p1169_p4 }
 0x62b   : > { %p1172_p12 = pnand %p1171_p9, %p1165_p7 }
 0x62d   : > { %1175 = shalt.err (!%p1172_p12)
}
 0x62e   : > { %1010 = dma.vmem_to_hbm [thread:$0]  (%p1361_p8), %s1741_s12, 256, %s1739_s23, %s856_s22  }
 0x62f PF: > { %s882_s13 = sand.u32 1, %s1206_s18   ;;  %p1830_p13 = scmp.ne.s32.totalorder %s1802_s25, 0 }
 0x630   : > { %p1831_p0 = scmp.ge.s32.totalorder %s1218_s21, 2  ;;  %s883_s14 = scalar_lea.sflag [#allocation5], %s882_s13 }
 0x632   : > { %p1021_p5 = pnand %p1831_p0, %p1830_p13 }
 0x634   : > { %1201 = dma.done.wait (!%p1021_p5), %s883_s14, 256  }
 0x635   : > { %1203 = vsyncadd (!%p1021_p5), %s883_s14, 4294967040  ;;  %p19_p10 = scmp.ge.s32.totalorder %s1317_s29, 4   ;;  %s1832_s18 = smov %s1210_s19 }
 0x636   : > { %s1833_s19 = smov %s1214_s20  ;;  %s1834_s20 = smov %s1353_s27 }
 0x637   : > { %s1835_s21 = smov %s1317_s29  ;;  %21 = sbr.rel (!%p19_p10) target bundleno = 6 (0x6), region = 89 }
 0x63e   :  { %888 = vsyncpa [#allocation4], 1 }
 0x63f   :  { %890 = vsyncpa [#allocation4 + $0x1], 1 }
 0x640   :  { %891 = vsyncpa [#allocation7], 1 }
 0x641   :  { %892 = vsyncpa [#allocation5], 1 }
 0x642   :  { %894 = vsyncpa [#allocation5 + $0x1], 1 }

</bundles_post_ra>
